<compile_context>
chip_gen: v7x
topology: tpu7x:2x2x1
jax: 0.10.0
libtpu: 0.0.40
codegen_flags: <defaults>
</compile_context>

<pallas_src>
import functools

import numpy as np
import jax
import jax.numpy as jnp
from jax.experimental import pallas as pl
from jax.experimental.pallas import tpu as pltpu

_EPS = 1e-12          # F.normalize default eps
_ROWS_CAP = 2048      # (2048, 72) f32 block: ~0.56 MiB logical / ~1 MiB lane-padded VMEM
_ROWS_MIN = 256       # floor that already sits near the measured HBM roofline


def _round_up(x, m):
    return ((x + m - 1) // m) * m


def _block_rows(n_rows):
    """Rows per grid step: ~8 steps, multiple of 8, within [256, 2048]."""
    if n_rows <= _ROWS_MIN:
        return n_rows                                  # single block == full extent (legal)
    tr = _round_up(pl.cdiv(n_rows, 8), 8)              # aim for ~8 steps (>=4 per TC on v7x)
    return max(_ROWS_MIN, min(_ROWS_CAP, tr))


def _vecnorm_kernel(x_ref, g_ref, o_ref, *, eps2):
    # x_ref/o_ref block: (TR, JD); g_ref: (JD, JD) constant 0/1 block-diagonal matrix.
    x = x_ref[...]
    if x.dtype != jnp.float32:                         # no-op for f32 inputs
        x = x.astype(jnp.float32)
    s = x * x                                          # VPU

    # Segment-sum over each group of D consecutive lanes, broadcast back to all D lanes
    # of the group, in a single MXU op (the MXU is otherwise idle in this kernel).
    sq = jnp.dot(s, g_ref[...],
                 preferred_element_type=jnp.float32,
                 precision=jax.lax.Precision.HIGHEST)  # f32-exact group sums

    inv_norm = jax.lax.rsqrt(jnp.maximum(sq, eps2))    # EUP; == 1 / max(||x||, eps)
    o_ref[...] = (x * inv_norm).astype(o_ref.dtype)


def vecnorm_encode(vecs, refs=None):
    """Pallas implementation of VecNormEncoder.forward.

    Args:
      vecs: (N_rays, M, N_joints, N_dims) array (M typically 1, N_dims=3).
      refs: optional (N_rays, N_pts, ...) array used only for shape expansion.

    Returns:
      (N_rays, N_pts_or_M, N_joints * N_dims) normalized vectors.
    """
    assert vecs.ndim >= 3
    N_rays, M = vecs.shape[0], vecs.shape[1]
    D = vecs.shape[-1]
    feat = 1
    for s in vecs.shape[2:]:
        feat *= s                                      # J * D (flatten(start_dim=2) width)
    B = N_rays * M

    # The consumer-layout view; any layout adjustment XLA needs for the trailing-dim
    # merge happens exactly once here (it is required by flatten(start_dim=2) anyway).
    x2 = vecs.reshape(B, feat)

    # Constant 0/1 block-diagonal "segment sum + broadcast" matrix (compile-time const).
    g = np.zeros((feat, feat), np.float32)
    for k in range(0, feat, D):
        g[k:k + D, k:k + D] = 1.0
    g = jnp.asarray(g)

    TR = _block_rows(B)
    grid = (pl.cdiv(B, TR),)

    kernel = functools.partial(_vecnorm_kernel, eps2=_EPS * _EPS)

    y2 = pl.pallas_call(
        kernel,
        out_shape=jax.ShapeDtypeStruct((B, feat), vecs.dtype),
        grid=grid,
        in_specs=[
            pl.BlockSpec((TR, feat), lambda i: (i, 0)),
            pl.BlockSpec((feat, feat), lambda i: (0, 0)),   # constant block: DMA'd once
        ],
        out_specs=pl.BlockSpec((TR, feat), lambda i: (i, 0)),
        compiler_params=pltpu.CompilerParams(
            dimension_semantics=("parallel",),
            vmem_limit_bytes=32 * 1024 * 1024,
        ),
    )(x2, g)

    n = y2.reshape(N_rays, M, feat)                    # flatten(start_dim=2) result shape

    if refs is not None:
        # torch .expand() semantics; stays a lazy/fusible broadcast under jit.
        n = jnp.broadcast_to(n, (refs.shape[0], refs.shape[1], feat))
    return n


def _reference(vecs, refs=None):
    denom = jnp.maximum(jnp.linalg.norm(vecs, axis=-1, keepdims=True), _EPS)
    n = (vecs / denom).reshape(vecs.shape[0], vecs.shape[1], -1)
    if refs is not None:
        n = jnp.broadcast_to(n, (refs.shape[0], refs.shape[1], n.shape[-1]))
    return n


if __name__ == "__main__":
    key = jax.random.PRNGKey(0)
    k1, k2, k3 = jax.random.split(key, 3)

    # --- case 1: module-sized example (single full-extent block, zero-vector safety) ---
    N_rays, N_pts, N_joints, N_dims = 2, 8, 24, 3
    vecs = jax.random.normal(k1, (N_rays, 1, N_joints, N_dims), dtype=jnp.float32)
    vecs = vecs.at[0, 0, 0, :].set(0.0)                # zero vector: must give 0, not NaN
    refs = jax.random.normal(k2, (N_rays, N_pts, 4), dtype=jnp.float32)

    fwd = jax.jit(vecnorm_encode)
    out = jax.block_until_ready(fwd(vecs, refs))
    ref = _reference(vecs, refs)
    assert out.shape == (N_rays, N_pts, N_joints * N_dims)
    assert bool(jnp.isfinite(out).all())
    assert jnp.allclose(out, ref, atol=1e-5), "mismatch vs reference (case 1)"

    # --- case 2: larger ray batch, refs=None (multi-step 'parallel' grid + partial block) ---
    vecs2 = jax.random.normal(k3, (1000, 1, N_joints, N_dims), dtype=jnp.float32)
    out2 = jax.block_until_ready(jax.jit(lambda v: vecnorm_encode(v))(vecs2))
    ref2 = _reference(vecs2)
    assert out2.shape == (1000, 1, N_joints * N_dims)
    assert jnp.allclose(out2, ref2, atol=1e-5), "mismatch vs reference (case 2)"

    print("KERNEL_OK")
</pallas_src>

<mosaic_0001>
module attributes {stable_mosaic.version = 11 : i64} {
  func.func @_vecnorm_kernel(%arg0: i32, %arg1: memref<2x72xf32, #tpu.memory_space<vmem>>, %arg2: memref<72x72xf32, #tpu.memory_space<vmem>>, %arg3: memref<2x72xf32, #tpu.memory_space<vmem>>) attributes {dimension_semantics = [#tpu.dimension_semantics<parallel>], iteration_bounds = array<i64: 1>, scalar_prefetch = 0 : i64, scratch_operands = 0 : i64, tpu.core_type = #tpu.core_type<tc>, window_params = [{transform_indices = @transform_0, window_bounds = array<i64: 2, 72>}, {pipeline_mode = #tpu.pipeline_mode<synchronous>, transform_indices = @transform_1, window_bounds = array<i64: 72, 72>}, {transform_indices = @transform_2, window_bounds = array<i64: 2, 72>}]} {
    %c0 = arith.constant 0 : index
    %c0_0 = arith.constant 0 : index
    %0 = vector.load %arg1[%c0, %c0_0] : memref<2x72xf32, #tpu.memory_space<vmem>>, vector<2x72xf32>
    %1 = arith.mulf %0, %0 : vector<2x72xf32>
    %c0_1 = arith.constant 0 : index
    %c0_2 = arith.constant 0 : index
    %2 = vector.load %arg2[%c0_1, %c0_2] : memref<72x72xf32, #tpu.memory_space<vmem>>, vector<72x72xf32>
    %cst = arith.constant dense<0.000000e+00> : vector<2x72xf32>
    %3 = tpu.matmul %1, %2, %cst {dimension_numbers = #tpu.dot_dimension_numbers<[1], [0], [0], [1], [0, 0, 1, 1], [], []>, precision = #tpu.contract_precision<fp32>} : vector<2x72xf32>, vector<72x72xf32>, vector<2x72xf32> -> vector<2x72xf32>
    %cst_3 = arith.constant 1.000000e-24 : f32
    %4 = vector.broadcast %cst_3 : f32 to vector<2x72xf32>
    %5 = arith.maximumf %3, %4 : vector<2x72xf32>
    %6 = math.rsqrt %5 : vector<2x72xf32>
    %7 = arith.mulf %0, %6 : vector<2x72xf32>
    %c0_4 = arith.constant 0 : index
    %c0_5 = arith.constant 0 : index
    %8 = vector.load %arg3[%c0_4, %c0_5] : memref<2x72xf32, #tpu.memory_space<vmem>>, vector<2x72xf32>
    tpu.vector_store %arg3[%c0_4, %c0_5], %7 {strides = array<i32>} : memref<2x72xf32, #tpu.memory_space<vmem>>, vector<2x72xf32>,
    return
  }
  func.func @transform_0(%arg0: i32) -> (i32, i32) {
    %c0_i32 = arith.constant 0 : i32
    %c0_i32_0 = arith.constant 0 : i32
    return %arg0, %c0_i32 : i32, i32
  }
  func.func @transform_1(%arg0: i32) -> (i32, i32) {
    %c0_i32 = arith.constant 0 : i32
    %c0_i32_0 = arith.constant 0 : i32
    %c0_i32_1 = arith.constant 0 : i32
    return %c0_i32, %c0_i32_0 : i32, i32
  }
  func.func @transform_2(%arg0: i32) -> (i32, i32) {
    %c0_i32 = arith.constant 0 : i32
    %c0_i32_0 = arith.constant 0 : i32
    return %arg0, %c0_i32 : i32, i32
  }
}

</mosaic_0001>

<bundles_post_ra>
// kernel: vecnorm_encode.1
= control target key start
LH: loop header
LB: loop body
LE: loop exit
PB: predicated region body
PF: predicated region fallthrough
CT: control target
= control target key end

     0   :  { %v857_v0 = vmov 0.0|0.0   ;;  %vm858_vm0 = vmmov 0   ;;  %v859_v8 = vmov 0.0   ;;  %vm22_vm1 = vcmask 588800   ;;  %s1037_s1 = inlined_call_operand.vmem [shape: f32[72,72], index: 1, kind: input, shape index: {}]   ;;  %s1038_s0 = inlined_call_operand.vmem [shape: f32[2,72], index: 0, kind: input, shape index: {}]   ;;  %s1039_s2 = inlined_call_operand.vmem [shape: f32[2,72], index: 2, kind: output, shape index: {}]  }
   0x1   :  { %771 = vmatprep.subr.bf16.mxu1 %v857_v0  ;;  %807 = vmatprep.subr.bf16.mxu0 %v857_v0  ;;  %v13_v1 = vld [vmem:[%s1037_s1] sm:$0xff]  ;;  %v14_v2 = vld [vmem:[%s1037_s1 + $0x8] sm:$0xff]  ;;  %v15_v3 = vld [vmem:[%s1037_s1 + $0x10] sm:$0xff]  ;;  %vm579_vm2 = vcmask 582656  }
   0x2   :  { %v27_v4 = vand.u32 4294901760, %v13_v1  ;;  %v30_v5 = vand.u32 4294901760, %v14_v2  ;;  %v16_v6 = vld [vmem:[%s1037_s1 + $0x18] sm:$0xff]  ;;  %v33_v7 = vand.u32 4294901760, %v15_v3  ;;  %663 = vmatprep.mubr.msk.f32.mxu1 %vm858_vm0, %v859_v8  ;;  %726 = vmatprep.mubr.msk.f32.mxu0 %vm858_vm0, %v859_v8  ;;  %v17_v10 = vld [vmem:[%s1037_s1 + $0x20] sm:$0xff]  ;;  %v18_v11 = vld [vmem:[%s1037_s1 + $0x28] sm:$0xff] }
   0x3   :  { %v36_v9 = vand.u32 4294901760, %v16_v6  ;;  %v908_v15 = vld [vmem:[%s1038_s0] sm:$0x3]  ;;  %v39_v17 = vand.u32 4294901760, %v17_v10  ;;  %v42_v18 = vand.u32 4294901760, %v18_v11  ;;  %v19_v19 = vld [vmem:[%s1037_s1 + $0x30] sm:$0xff] }
   0x4   :  { %v899_v12 = vpack.c.bf16 %v30_v5, %v27_v4  ;;  %v901_v13 = vsub.f32 %v13_v1, %v27_v4  ;;  %v903_v14 = vsub.f32 %v14_v2, %v30_v5  ;;  %v20_v20 = vld [vmem:[%s1037_s1 + $0x38] sm:$0xff]  ;;  %v12_v21 = vmul.f32 %v908_v15, %v908_v15  ;;  %v21_v41 = vld [vmem:[%s1037_s1 + $0x40] sm:$0xff] }
   0x5   :  { %v912_v16 = vpack.c.bf16 %v36_v9, %v33_v7  ;;  %v924_v22 = vsub.f32 %v15_v3, %v33_v7  ;;  %v928_v25 = vsub.f32 %v16_v6, %v36_v9  ;;  %v932_v27 = vpack.c.bf16 %v42_v18, %v39_v17 }
   0x6   :  { %773 = vmatpush3.bf16.msra.mxu1 %v899_v12  ;;  %809 = vmatpush3.bf16.msra.mxu0 %v899_v12  ;;  %v113_v23 = vand.u32 4294901760, %v901_v13  ;;  %v120_v24 = vand.u32 4294901760, %v903_v14  ;;  %v24_v26 = vsel %vm22_vm1, %v12_v21, 0  ;;  %v45_v28 = vand.u32 4294901760, %v19_v19 }
   0x7   :  { %774 = vmatprep.subr.bf16.mxu1 %v857_v0  ;;  %810 = vmatprep.subr.bf16.mxu0 %v857_v0  ;;  %v48_v29 = vand.u32 4294901760, %v20_v20  ;;  %v934_v30 = vand.u32 4294901760, %v24_v26  ;;  %v127_v34 = vand.u32 4294901760, %v924_v22  ;;  %v944_v35 = vsub.f32 %v17_v10, %v39_v17 }
   0x8   :  { %v114_v32 = vsub.f32 %v901_v13, %v113_v23  ;;  %v121_v33 = vsub.f32 %v903_v14, %v120_v24  ;;  %v946_v36 = vsub.f32 %v18_v11, %v42_v18  ;;  %v134_v37 = vand.u32 4294901760, %v928_v25 }
   0x9   :  { %v939_v31 = vsub.f32 %v24_v26, %v934_v30  ;;  %v951_v38 = vpack.c.bf16 %v48_v29, %v45_v28  ;;  %v956_v40 = vsub.f32 %v19_v19, %v45_v28  ;;  %v128_v45 = vsub.f32 %v924_v22, %v127_v34 }
   0xa   :  { %776 = vmatpush3.bf16.msra.mxu1 %v912_v16  ;;  %812 = vmatpush3.bf16.msra.mxu0 %v912_v16  ;;  %v115_v43 = vand.u32 4294901760, %v114_v32  ;;  %v122_v44 = vand.u32 4294901760, %v121_v33  ;;  %v963_v46 = vsub.f32 %v20_v20, %v48_v29  ;;  %v135_v47 = vsub.f32 %v928_v25, %v134_v37 }
   0xb   :  { %777 = vmatprep.subr.bf16.mxu1 %v857_v0  ;;  %813 = vmatprep.subr.bf16.mxu0 %v857_v0  ;;  %v102_v39 = vand.u32 4294901760, %v939_v31  ;;  %v141_v48 = vand.u32 4294901760, %v944_v35  ;;  %v148_v49 = vand.u32 4294901760, %v946_v36  ;;  %v970_v50 = vand.u32 4294901760, %v21_v41 }
   0xc   :  { %v820_v51 = vpack.c.bf16 %v120_v24, %v113_v23  ;;  %v784_v53 = vpack.c.bf16 %v122_v44, %v115_v43  ;;  %v129_v54 = vand.u32 4294901760, %v128_v45  ;;  %v155_v55 = vand.u32 4294901760, %v956_v40 }
   0xd   :  { %v103_v42 = vsub.f32 %v939_v31, %v102_v39  ;;  %v136_v56 = vand.u32 4294901760, %v135_v47  ;;  %v142_v57 = vsub.f32 %v944_v35, %v141_v48  ;;  %v149_v58 = vsub.f32 %v946_v36, %v148_v49 }
   0xe   :  { %779 = vmatpush3.bf16.msra.mxu1 %v932_v27  ;;  %815 = vmatpush3.bf16.msra.mxu0 %v932_v27  ;;  %v162_v59 = vand.u32 4294901760, %v963_v46  ;;  %v983_v60 = vsub.f32 %v21_v41, %v970_v50  ;;  %v823_v61 = vpack.c.bf16 %v134_v37, %v127_v34  ;;  %v156_v62 = vsub.f32 %v956_v40, %v155_v55 }
   0xf   :  { %780 = vmatprep.subr.bf16.mxu1 %v857_v0  ;;  %816 = vmatprep.subr.bf16.mxu0 %v857_v0  ;;  %v104_v52 = vand.u32 4294901760, %v103_v42  ;;  %v787_v63 = vpack.c.bf16 %v136_v56, %v129_v54  ;;  %v143_v1 = vand.u32 4294901760, %v142_v57  ;;  %v150_v2 = vand.u32 4294901760, %v149_v58 }
  0x10   :  { %v163_v3 = vsub.f32 %v963_v46, %v162_v59  ;;  %v826_v4 = vpack.c.bf16 %v148_v49, %v141_v48  ;;  %v157_v6 = vand.u32 4294901760, %v156_v62  ;;  %v169_v9 = vand.u32 4294901760, %v983_v60 }
  0x11   :  { %v790_v5 = vpack.c.bf16 %v150_v2, %v143_v1  ;;  %v829_v11 = vpack.c.bf16 %v162_v59, %v155_v55  ;;  %v796_v19 = vpack.c.bf16 %v903_v14, %v901_v13  ;;  %v799_v20 = vpack.c.bf16 %v928_v25, %v924_v22 }
  0x12   :  { %782 = vmatpush3.bf16.msra.mxu1 %v951_v38  ;;  %818 = vmatpush3.bf16.msra.mxu0 %v951_v38  ;;  %v164_v7 = vand.u32 4294901760, %v163_v3  ;;  %v170_v17 = vsub.f32 %v983_v60, %v169_v9  ;;  %v802_v13 = vpack.c.bf16 %v946_v36, %v944_v35 }
  0x13   :  { %661 = vmatprep.subr.mxu1 %v859_v8  ;;  %724 = vmatprep.subr.mxu0 %v859_v8 }
  0x14   :  { %v793_v10 = vpack.c.bf16 %v164_v7, %v157_v6  ;;  %v171_v18 = vand.u32 4294901760, %v170_v17 }
  0x16   :  { %662 = vmatpush3.msra.mxu1 %v970_v50  ;;  %725 = vmatpush3.msra.mxu0 %v970_v50 }
  0x17   :  { %783 = vmatprep.subr.bf16.mxu1 %v857_v0  ;;  %819 = vmatprep.subr.bf16.mxu0 %v857_v0 }
  0x18   :  { %664 = vmatmul.mubr.f32.vlgmr.msra.gmra.mrb[0].mxu1 %v104_v52  ;;  %727 = vmatmul.mubr.f32.vlgmr.msra.gmra.mrb[0].mxu0 %v102_v39 }
  0x19   :  { %785 = vmatpush3.bf16.msra.mxu1 %v784_v53  ;;  %821 = vmatpush3.bf16.msra.mxu0 %v820_v51 }
  0x1a   :  { %786 = vmatprep.subr.bf16.mxu1 %v857_v0  ;;  %822 = vmatprep.subr.bf16.mxu0 %v857_v0 }
  0x1b   :  { %684 = vmatprep.mubr.msk.f32.mxu1 %vm858_vm0, %v859_v8  ;;  %747 = vmatprep.mubr.msk.f32.mxu0 %vm858_vm0, %v859_v8 }
  0x1d   :  { %788 = vmatpush3.bf16.msra.mxu1 %v787_v63  ;;  %824 = vmatpush3.bf16.msra.mxu0 %v823_v61 }
  0x1e   :  { %789 = vmatprep.subr.bf16.mxu1 %v857_v0  ;;  %825 = vmatprep.subr.bf16.mxu0 %v857_v0 }
  0x21   :  { %791 = vmatpush3.bf16.msra.mxu1 %v790_v5  ;;  %827 = vmatpush3.bf16.msra.mxu0 %v826_v4 }
  0x22   :  { %792 = vmatprep.subr.bf16.mxu1 %v857_v0  ;;  %828 = vmatprep.subr.bf16.mxu0 %v857_v0 }
  0x25   :  { %794 = vmatpush3.bf16.msra.mxu1 %v793_v10  ;;  %830 = vmatpush3.bf16.msra.mxu0 %v829_v11 }
  0x26   :  { %682 = vmatprep.subr.mxu1 %v859_v8  ;;  %745 = vmatprep.subr.mxu0 %v859_v8 }
  0x29   :  { %683 = vmatpush3.msra.mxu1 %v171_v18  ;;  %746 = vmatpush3.msra.mxu0 %v169_v9 }
  0x2a   :  { %795 = vmatprep.subr.bf16.mxu1 %v857_v0  ;;  %831 = vmatprep.subr.bf16.mxu0 %v857_v0 }
  0x2b   :  { %685 = vmatmul.mubr.f32.vlgmr.msra.gmra.mrb[0].mxu1 %v934_v30  ;;  %748 = vmatmul.mubr.f32.vlgmr.msra.gmra.mrb[0].mxu0 %v934_v30 }
  0x2c   :  { %797 = vmatpush3.bf16.msra.mxu1 %v796_v19  ;;  %833 = vmatpush3.bf16.msra.mxu0 %v899_v12  ;;  %v805_v12 = vpack.c.bf16 %v963_v46, %v956_v40 }
  0x2d   :  { %798 = vmatprep.subr.bf16.mxu1 %v857_v0  ;;  %834 = vmatprep.subr.bf16.mxu0 %v857_v0 }
  0x2e   :  { %705 = vmatprep.mubr.msk.f32.mxu1 %vm858_vm0, %v859_v8  ;;  %768 = vmatprep.mubr.msk.f32.mxu0 %vm858_vm0, %v859_v8 }
  0x30   :  { %800 = vmatpush3.bf16.msra.mxu1 %v799_v20  ;;  %836 = vmatpush3.bf16.msra.mxu0 %v912_v16 }
  0x31   :  { %801 = vmatprep.subr.bf16.mxu1 %v857_v0  ;;  %837 = vmatprep.subr.bf16.mxu0 %v857_v0 }
  0x34   :  { %803 = vmatpush3.bf16.msra.mxu1 %v802_v13  ;;  %839 = vmatpush3.bf16.msra.mxu0 %v932_v27 }
  0x35   :  { %804 = vmatprep.subr.bf16.mxu1 %v857_v0  ;;  %840 = vmatprep.subr.bf16.mxu0 %v857_v0 }
  0x38   :  { %806 = vmatpush3.bf16.msra.mxu1 %v805_v12  ;;  %842 = vmatpush3.bf16.msra.mxu0 %v951_v38 }
  0x39   :  { %703 = vmatprep.subr.mxu1 %v859_v8  ;;  %766 = vmatprep.subr.mxu0 %v859_v8 }
  0x3c   :  { %704 = vmatpush3.msra.mxu1 %v983_v60  ;;  %767 = vmatpush3.msra.mxu0 %v970_v50 }
  0x3d   :  { %706 = vmatmul.mubr.f32.vlgmr.msra.gmra.mrb[0].mxu1 %v939_v31  ;;  %769 = vmatmul.mubr.f32.vlgmr.msra.gmra.mrb[0].mxu0 %v934_v30 }
 0x110   :  { %v312_v14 = vpop.f32.mrb[0].mxu1  ;;  %v572_v16 = vpop.f32.mrb[0].mxu0 }
 0x111   :  { %v843_v21 = vadd.f32 %v572_v16, %v312_v14  ;;  %v707_v22 = vpop.f32.mrb[1].mxu1  ;;  %v770_v0 = vpop.f32.mrb[1].mxu0 }
 0x113   :  { %v576_v23 = vmax.f32 %v843_v21, 1e-24 }
 0x115   :  { %855 = vrsqrt.f32 %v576_v23 }
 0x11f   :  { %v856_v24 = vpop.eup %855 }
 0x120   :  { %v578_v25 = vmul.f32 %v856_v24, %v908_v15 }
 0x122   :  { %580 = vst.msk [vmem:[%s1039_s2] sm:$0x3] %vm579_vm2, %v578_v25 }

</bundles_post_ra>
